<compile_context>
chip_gen: v5e
topology: v5e:2x2
jax: 0.10.0
libtpu: 0.0.40
codegen_flags: <defaults>
</compile_context>

<pallas_src>
import functools
import math

import jax
import jax.numpy as jnp
from jax.experimental import pallas as pl
from jax.experimental.pallas import tpu as pltpu


def _round_up(a, m):
    return ((a + m - 1) // m) * m


def _block_linear_kernel(x_ref, w_ref, b_ref, o_ref, *, group, in_f, out_f):
    # x_ref: (tm, group*in_f)       -- batch tile, columns of the `group` blocks of this step
    # w_ref: (group, in_f, out_f)   -- stacked (pre-transposed) weights for those blocks
    # b_ref: (1, n_blocks*out_f)    -- FULL bias, resident in VMEM (loaded once)
    # o_ref: (tm, group*out_f)      -- batch tile, output columns of those blocks
    g = pl.program_id(1)  # block-group index
    for j in range(group):  # static unroll: `group` MXU matmuls per grid step
        xj = x_ref[:, j * in_f:(j + 1) * in_f].astype(w_ref.dtype)
        acc = jnp.dot(xj, w_ref[j], preferred_element_type=jnp.float32)
        bias_start = pl.multiple_of(g * (group * out_f) + j * out_f, 128)
        bj = b_ref[:, pl.ds(bias_start, out_f)]            # (1, out_f), f32
        o_ref[:, j * out_f:(j + 1) * out_f] = (acc + bj).astype(o_ref.dtype)


def _pick_group(n_blocks, in_f, out_f, batch_tile, x_bytes, w_bytes, o_bytes,
                budget_bytes):
    """Largest divisor of n_blocks whose double-buffered working set fits the budget."""
    best = 1
    for g in range(1, n_blocks + 1):
        if n_blocks % g:
            continue
        ws = 2 * (batch_tile * g * in_f * x_bytes
                  + g * in_f * out_f * w_bytes
                  + batch_tile * g * out_f * o_bytes)
        if ws <= budget_bytes:
            best = g
    return best


def block_linear(x, w_t, b, *, group=None, batch_tile=None, weight_dtype=None,
                 vmem_budget_bytes=40 * 1024 * 1024):
    """x: (B, n_blocks*in_f); w_t: (n_blocks, in_f, out_f); b: (n_blocks, out_f)."""
    n_blocks, in_f, out_f = w_t.shape
    batch, x_dim = x.shape
    assert x_dim == n_blocks * in_f, "x width must be n_blocks * in_features"
    assert in_f % 128 == 0 and out_f % 128 == 0, (
        "in_features/out_features must be multiples of 128 for TPU lane tiling")
    # TODO(synk): pad in_f/out_f to 128 multiples in the wrapper for arbitrary sizes.

    if weight_dtype is not None:
        w_t = w_t.astype(weight_dtype)          # e.g. bf16 weights: halves HBM traffic
    b2 = b.astype(jnp.float32).reshape(1, n_blocks * out_f)   # bias add stays f32

    out_dtype = x.dtype
    x_bytes = jnp.dtype(x.dtype).itemsize
    w_bytes = jnp.dtype(w_t.dtype).itemsize
    o_bytes = jnp.dtype(out_dtype).itemsize

    # ---- batch tiling (8-aligned, padded if needed) ----
    if batch_tile is None:
        batch_tile = min(256, _round_up(batch, 8))
    batch_tile = max(8, (batch_tile // 8) * 8)
    padded_batch = _round_up(batch, batch_tile)
    if padded_batch != batch:
        x = jnp.pad(x, ((0, padded_batch - batch), (0, 0)))

    # ---- block grouping (amortize per-step overhead; widen output stores) ----
    if group is None:
        group = _pick_group(n_blocks, in_f, out_f, batch_tile,
                            x_bytes, w_bytes, o_bytes, vmem_budget_bytes)
    assert n_blocks % group == 0, "group must divide n_blocks"

    # ---- explicit VMEM budget (double-buffered tiles + resident bias + headroom) ----
    working_set = 2 * (batch_tile * group * in_f * x_bytes
                       + group * in_f * out_f * w_bytes
                       + batch_tile * group * out_f * o_bytes)
    bias_bytes = n_blocks * out_f * 4
    vmem_limit = min(64 * 1024 * 1024,
                     max(16 * 1024 * 1024, working_set + bias_bytes + 4 * 1024 * 1024))

    grid = (padded_batch // batch_tile, n_blocks // group)

    kernel = functools.partial(_block_linear_kernel,
                               group=group, in_f=in_f, out_f=out_f)

    total_bytes = (padded_batch * n_blocks * in_f * x_bytes
                   + n_blocks * in_f * out_f * w_bytes
                   + bias_bytes
                   + padded_batch * n_blocks * out_f * o_bytes)

    out = pl.pallas_call(
        kernel,
        out_shape=jax.ShapeDtypeStruct((padded_batch, n_blocks * out_f), out_dtype),
        grid_spec=pltpu.PrefetchScalarGridSpec(
            num_scalar_prefetch=0,
            grid=grid,
            in_specs=[
                # x tile: (tm, group*in_f), lane-dense
                pl.BlockSpec((batch_tile, group * in_f), lambda i, g: (i, g)),
                # weights for this block-group: (group, in_f, out_f)
                pl.BlockSpec((group, in_f, out_f), lambda i, g: (g, 0, 0)),
                # full bias, resident in VMEM (loaded once, no per-step streaming)
                pl.BlockSpec(memory_space=pltpu.MemorySpace.VMEM),
            ],
            out_specs=pl.BlockSpec((batch_tile, group * out_f), lambda i, g: (i, g)),
        ),
        compiler_params=pltpu.CompilerParams(
            dimension_semantics=("parallel", "parallel"),
            vmem_limit_bytes=int(vmem_limit),
        ),
        cost_estimate=pl.CostEstimate(
            flops=2 * padded_batch * n_blocks * in_f * out_f,
            transcendentals=0,
            bytes_accessed=int(total_bytes),
        ),
    )(x, w_t, b2)

    return out[:batch]


def init_block_linear_params(key, n_blocks, in_features, out_features,
                             dtype=jnp.float32):
    """Deterministic init matching the PyTorch module's __init__.

    kaiming_uniform_ (a=0 default -> gain sqrt(2), fan_in mode): bound_w = sqrt(6 / in_features)
    bias: uniform(-1/sqrt(in_features), 1/sqrt(in_features))
    """
    kw, kb = jax.random.split(key)
    bound_w = math.sqrt(6.0 / in_features)
    bound_b = 1.0 / math.sqrt(in_features)
    # Stored like each torch weight (out_f, in_f), then transposed for the kernel.
    w = jax.random.uniform(kw, (n_blocks, out_features, in_features),
                           minval=-bound_w, maxval=bound_w, dtype=dtype)
    b = jax.random.uniform(kb, (n_blocks, out_features),
                           minval=-bound_b, maxval=bound_b, dtype=dtype)
    w_t = jnp.transpose(w, (0, 2, 1))
    return w_t, b


def block_linear_ref(x, w_t, b):
    """Pure-JAX reference reproducing the PyTorch forward."""
    n_blocks, in_f, out_f = w_t.shape
    batch = x.shape[0]
    xb = x.reshape(batch, n_blocks, in_f)
    yb = jnp.einsum("bni,nio->bno", xb, w_t) + b[None, :, :]
    return yb.reshape(batch, n_blocks * out_f)


if __name__ == "__main__":
    # Small, TPU-tile-friendly shapes consistent with the module.
    batch = 16
    n_blocks = 6
    in_features = 128
    out_features = 128

    key = jax.random.PRNGKey(0)
    kx, kp = jax.random.split(key)

    x = jax.random.normal(kx, (batch, n_blocks * in_features), dtype=jnp.float32)
    w_t, b = init_block_linear_params(kp, n_blocks, in_features, out_features)

    ref = block_linear_ref(x, w_t, b)

    # 1) Auto-tuned grouping / batch tile, f32 weights.
    out = jax.block_until_ready(block_linear(x, w_t, b))
    assert out.shape == (batch, n_blocks * out_features)
    assert jnp.allclose(out, ref, atol=1e-5, rtol=1e-5), "mismatch (auto config)"

    # 2) Explicit multi-step grid (2 batch tiles x 3 block groups), f32 weights.
    out2 = jax.block_until_ready(block_linear(x, w_t, b, group=2, batch_tile=8))
    assert jnp.allclose(out2, ref, atol=1e-5, rtol=1e-5), "mismatch (group=2, tm=8)"

    # 3) bf16 weight storage (memory-bound win); f32 MXU accumulation + f32 bias add.
    out3 = jax.block_until_ready(block_linear(x, w_t, b, weight_dtype=jnp.bfloat16))
    assert jnp.allclose(out3, ref, atol=5e-2, rtol=5e-2), "mismatch (bf16 weights)"

    print("KERNEL_OK")
</pallas_src>

<mosaic_0001>
module attributes {stable_mosaic.version = 11 : i64} {
  func.func @_block_linear_kernel(%arg0: i32, %arg1: i32, %arg2: memref<16x768xf32, #tpu.memory_space<vmem>>, %arg3: memref<6x128x128xf32, #tpu.memory_space<vmem>>, %arg4: memref<1x768xf32, #tpu.memory_space<vmem>>, %arg5: memref<16x768xf32, #tpu.memory_space<vmem>>) attributes {dimension_semantics = [#tpu.dimension_semantics<parallel>, #tpu.dimension_semantics<parallel>], iteration_bounds = array<i64: 1, 1>, scalar_prefetch = 0 : i64, scratch_operands = 0 : i64, tpu.core_type = #tpu.core_type<tc>, window_params = [{transform_indices = @transform_0, window_bounds = array<i64: 16, 768>}, {transform_indices = @transform_1, window_bounds = array<i64: 6, 128, 128>}, {pipeline_mode = #tpu.pipeline_mode<synchronous>, transform_indices = @transform_2, window_bounds = array<i64: 1, 768>}, {transform_indices = @transform_3, window_bounds = array<i64: 16, 768>}]} {
    %c0 = arith.constant 0 : index
    %c0_0 = arith.constant 0 : index
    %0 = vector.load %arg2[%c0, %c0_0] : memref<16x768xf32, #tpu.memory_space<vmem>>, vector<16x128xf32>
    %c0_1 = arith.constant 0 : index
    %c0_2 = arith.constant 0 : index
    %c0_3 = arith.constant 0 : index
    %1 = vector.load %arg3[%c0_1, %c0_2, %c0_3] : memref<6x128x128xf32, #tpu.memory_space<vmem>>, vector<1x128x128xf32>
    %2 = vector.shape_cast %1 : vector<1x128x128xf32> to vector<128x128xf32>
    %cst = arith.constant dense<0.000000e+00> : vector<16x128xf32>
    %3 = tpu.matmul %0, %2, %cst {dimension_numbers = #tpu.dot_dimension_numbers<[1], [0], [0], [1], [0, 0, 1, 1], [], []>} : vector<16x128xf32>, vector<128x128xf32>, vector<16x128xf32> -> vector<16x128xf32>
    %c768_i32 = arith.constant 768 : i32
    %4 = arith.muli %arg1, %c768_i32 : i32
    %c0_i32 = arith.constant 0 : i32
    %5 = arith.addi %4, %c0_i32 : i32
    %6 = tpu.assume_multiple %5, 128 : i32
    %c0_4 = arith.constant 0 : index
    %7 = arith.index_cast %6 : i32 to index
    %8 = vector.load %arg4[%c0_4, %7] : memref<1x768xf32, #tpu.memory_space<vmem>>, vector<1x128xf32>
    %9 = vector.broadcast %8 : vector<1x128xf32> to vector<16x128xf32>
    %10 = arith.addf %3, %9 : vector<16x128xf32>
    %c0_5 = arith.constant 0 : index
    %c0_6 = arith.constant 0 : index
    %11 = vector.load %arg5[%c0_5, %c0_6] : memref<16x768xf32, #tpu.memory_space<vmem>>, vector<16x128xf32>
    tpu.vector_store %arg5[%c0_5, %c0_6], %10 {strides = array<i32>} : memref<16x768xf32, #tpu.memory_space<vmem>>, vector<16x128xf32>,
    %c0_7 = arith.constant 0 : index
    %c128 = arith.constant 128 : index
    %12 = vector.load %arg2[%c0_7, %c128] : memref<16x768xf32, #tpu.memory_space<vmem>>, vector<16x128xf32>
    %c1 = arith.constant 1 : index
    %c0_8 = arith.constant 0 : index
    %c0_9 = arith.constant 0 : index
    %13 = vector.load %arg3[%c1, %c0_8, %c0_9] : memref<6x128x128xf32, #tpu.memory_space<vmem>>, vector<1x128x128xf32>
    %14 = vector.shape_cast %13 : vector<1x128x128xf32> to vector<128x128xf32>
    %cst_10 = arith.constant dense<0.000000e+00> : vector<16x128xf32>
    %15 = tpu.matmul %12, %14, %cst_10 {dimension_numbers = #tpu.dot_dimension_numbers<[1], [0], [0], [1], [0, 0, 1, 1], [], []>} : vector<16x128xf32>, vector<128x128xf32>, vector<16x128xf32> -> vector<16x128xf32>
    %c768_i32_11 = arith.constant 768 : i32
    %16 = arith.muli %arg1, %c768_i32_11 : i32
    %c128_i32 = arith.constant 128 : i32
    %17 = arith.addi %16, %c128_i32 : i32
    %18 = tpu.assume_multiple %17, 128 : i32
    %c0_12 = arith.constant 0 : index
    %19 = arith.index_cast %18 : i32 to index
    %20 = vector.load %arg4[%c0_12, %19] : memref<1x768xf32, #tpu.memory_space<vmem>>, vector<1x128xf32>
    %21 = vector.broadcast %20 : vector<1x128xf32> to vector<16x128xf32>
    %22 = arith.addf %15, %21 : vector<16x128xf32>
    %c0_13 = arith.constant 0 : index
    %c128_14 = arith.constant 128 : index
    %23 = vector.load %arg5[%c0_13, %c128_14] : memref<16x768xf32, #tpu.memory_space<vmem>>, vector<16x128xf32>
    tpu.vector_store %arg5[%c0_13, %c128_14], %22 {strides = array<i32>} : memref<16x768xf32, #tpu.memory_space<vmem>>, vector<16x128xf32>,
    %c0_15 = arith.constant 0 : index
    %c256 = arith.constant 256 : index
    %24 = vector.load %arg2[%c0_15, %c256] : memref<16x768xf32, #tpu.memory_space<vmem>>, vector<16x128xf32>
    %c2 = arith.constant 2 : index
    %c0_16 = arith.constant 0 : index
    %c0_17 = arith.constant 0 : index
    %25 = vector.load %arg3[%c2, %c0_16, %c0_17] : memref<6x128x128xf32, #tpu.memory_space<vmem>>, vector<1x128x128xf32>
    %26 = vector.shape_cast %25 : vector<1x128x128xf32> to vector<128x128xf32>
    %cst_18 = arith.constant dense<0.000000e+00> : vector<16x128xf32>
    %27 = tpu.matmul %24, %26, %cst_18 {dimension_numbers = #tpu.dot_dimension_numbers<[1], [0], [0], [1], [0, 0, 1, 1], [], []>} : vector<16x128xf32>, vector<128x128xf32>, vector<16x128xf32> -> vector<16x128xf32>
    %c768_i32_19 = arith.constant 768 : i32
    %28 = arith.muli %arg1, %c768_i32_19 : i32
    %c256_i32 = arith.constant 256 : i32
    %29 = arith.addi %28, %c256_i32 : i32
    %30 = tpu.assume_multiple %29, 128 : i32
    %c0_20 = arith.constant 0 : index
    %31 = arith.index_cast %30 : i32 to index
    %32 = vector.load %arg4[%c0_20, %31] : memref<1x768xf32, #tpu.memory_space<vmem>>, vector<1x128xf32>
    %33 = vector.broadcast %32 : vector<1x128xf32> to vector<16x128xf32>
    %34 = arith.addf %27, %33 : vector<16x128xf32>
    %c0_21 = arith.constant 0 : index
    %c256_22 = arith.constant 256 : index
    %35 = vector.load %arg5[%c0_21, %c256_22] : memref<16x768xf32, #tpu.memory_space<vmem>>, vector<16x128xf32>
    tpu.vector_store %arg5[%c0_21, %c256_22], %34 {strides = array<i32>} : memref<16x768xf32, #tpu.memory_space<vmem>>, vector<16x128xf32>,
    %c0_23 = arith.constant 0 : index
    %c384 = arith.constant 384 : index
    %36 = vector.load %arg2[%c0_23, %c384] : memref<16x768xf32, #tpu.memory_space<vmem>>, vector<16x128xf32>
    %c3 = arith.constant 3 : index
    %c0_24 = arith.constant 0 : index
    %c0_25 = arith.constant 0 : index
    %37 = vector.load %arg3[%c3, %c0_24, %c0_25] : memref<6x128x128xf32, #tpu.memory_space<vmem>>, vector<1x128x128xf32>
    %38 = vector.shape_cast %37 : vector<1x128x128xf32> to vector<128x128xf32>
    %cst_26 = arith.constant dense<0.000000e+00> : vector<16x128xf32>
    %39 = tpu.matmul %36, %38, %cst_26 {dimension_numbers = #tpu.dot_dimension_numbers<[1], [0], [0], [1], [0, 0, 1, 1], [], []>} : vector<16x128xf32>, vector<128x128xf32>, vector<16x128xf32> -> vector<16x128xf32>
    %c768_i32_27 = arith.constant 768 : i32
    %40 = arith.muli %arg1, %c768_i32_27 : i32
    %c384_i32 = arith.constant 384 : i32
    %41 = arith.addi %40, %c384_i32 : i32
    %42 = tpu.assume_multiple %41, 128 : i32
    %c0_28 = arith.constant 0 : index
    %43 = arith.index_cast %42 : i32 to index
    %44 = vector.load %arg4[%c0_28, %43] : memref<1x768xf32, #tpu.memory_space<vmem>>, vector<1x128xf32>
    %45 = vector.broadcast %44 : vector<1x128xf32> to vector<16x128xf32>
    %46 = arith.addf %39, %45 : vector<16x128xf32>
    %c0_29 = arith.constant 0 : index
    %c384_30 = arith.constant 384 : index
    %47 = vector.load %arg5[%c0_29, %c384_30] : memref<16x768xf32, #tpu.memory_space<vmem>>, vector<16x128xf32>
    tpu.vector_store %arg5[%c0_29, %c384_30], %46 {strides = array<i32>} : memref<16x768xf32, #tpu.memory_space<vmem>>, vector<16x128xf32>,
    %c0_31 = arith.constant 0 : index
    %c512 = arith.constant 512 : index
    %48 = vector.load %arg2[%c0_31, %c512] : memref<16x768xf32, #tpu.memory_space<vmem>>, vector<16x128xf32>
    %c4 = arith.constant 4 : index
    %c0_32 = arith.constant 0 : index
    %c0_33 = arith.constant 0 : index
    %49 = vector.load %arg3[%c4, %c0_32, %c0_33] : memref<6x128x128xf32, #tpu.memory_space<vmem>>, vector<1x128x128xf32>
    %50 = vector.shape_cast %49 : vector<1x128x128xf32> to vector<128x128xf32>
    %cst_34 = arith.constant dense<0.000000e+00> : vector<16x128xf32>
    %51 = tpu.matmul %48, %50, %cst_34 {dimension_numbers = #tpu.dot_dimension_numbers<[1], [0], [0], [1], [0, 0, 1, 1], [], []>} : vector<16x128xf32>, vector<128x128xf32>, vector<16x128xf32> -> vector<16x128xf32>
    %c768_i32_35 = arith.constant 768 : i32
    %52 = arith.muli %arg1, %c768_i32_35 : i32
    %c512_i32 = arith.constant 512 : i32
    %53 = arith.addi %52, %c512_i32 : i32
    %54 = tpu.assume_multiple %53, 128 : i32
    %c0_36 = arith.constant 0 : index
    %55 = arith.index_cast %54 : i32 to index
    %56 = vector.load %arg4[%c0_36, %55] : memref<1x768xf32, #tpu.memory_space<vmem>>, vector<1x128xf32>
    %57 = vector.broadcast %56 : vector<1x128xf32> to vector<16x128xf32>
    %58 = arith.addf %51, %57 : vector<16x128xf32>
    %c0_37 = arith.constant 0 : index
    %c512_38 = arith.constant 512 : index
    %59 = vector.load %arg5[%c0_37, %c512_38] : memref<16x768xf32, #tpu.memory_space<vmem>>, vector<16x128xf32>
    tpu.vector_store %arg5[%c0_37, %c512_38], %58 {strides = array<i32>} : memref<16x768xf32, #tpu.memory_space<vmem>>, vector<16x128xf32>,
    %c0_39 = arith.constant 0 : index
    %c640 = arith.constant 640 : index
    %60 = vector.load %arg2[%c0_39, %c640] : memref<16x768xf32, #tpu.memory_space<vmem>>, vector<16x128xf32>
    %c5 = arith.constant 5 : index
    %c0_40 = arith.constant 0 : index
    %c0_41 = arith.constant 0 : index
    %61 = vector.load %arg3[%c5, %c0_40, %c0_41] : memref<6x128x128xf32, #tpu.memory_space<vmem>>, vector<1x128x128xf32>
    %62 = vector.shape_cast %61 : vector<1x128x128xf32> to vector<128x128xf32>
    %cst_42 = arith.constant dense<0.000000e+00> : vector<16x128xf32>
    %63 = tpu.matmul %60, %62, %cst_42 {dimension_numbers = #tpu.dot_dimension_numbers<[1], [0], [0], [1], [0, 0, 1, 1], [], []>} : vector<16x128xf32>, vector<128x128xf32>, vector<16x128xf32> -> vector<16x128xf32>
    %c768_i32_43 = arith.constant 768 : i32
    %64 = arith.muli %arg1, %c768_i32_43 : i32
    %c640_i32 = arith.constant 640 : i32
    %65 = arith.addi %64, %c640_i32 : i32
    %66 = tpu.assume_multiple %65, 128 : i32
    %c0_44 = arith.constant 0 : index
    %67 = arith.index_cast %66 : i32 to index
    %68 = vector.load %arg4[%c0_44, %67] : memref<1x768xf32, #tpu.memory_space<vmem>>, vector<1x128xf32>
    %69 = vector.broadcast %68 : vector<1x128xf32> to vector<16x128xf32>
    %70 = arith.addf %63, %69 : vector<16x128xf32>
    %c0_45 = arith.constant 0 : index
    %c640_46 = arith.constant 640 : index
    %71 = vector.load %arg5[%c0_45, %c640_46] : memref<16x768xf32, #tpu.memory_space<vmem>>, vector<16x128xf32>
    tpu.vector_store %arg5[%c0_45, %c640_46], %70 {strides = array<i32>} : memref<16x768xf32, #tpu.memory_space<vmem>>, vector<16x128xf32>,
    return
  }
  func.func @transform_0(%arg0: i32, %arg1: i32) -> (i32, i32) {
    %c0_i32 = arith.constant 0 : i32
    return %arg0, %arg1 : i32, i32
  }
  func.func @transform_1(%arg0: i32, %arg1: i32) -> (i32, i32, i32) {
    %c0_i32 = arith.constant 0 : i32
    %c0_i32_0 = arith.constant 0 : i32
    %c0_i32_1 = arith.constant 0 : i32
    return %arg1, %c0_i32, %c0_i32_0 : i32, i32, i32
  }
  func.func @transform_2(%arg0: i32, %arg1: i32) -> (i32, i32) {
    %c0_i32 = arith.constant 0 : i32
    %c0_i32_0 = arith.constant 0 : i32
    %c0_i32_1 = arith.constant 0 : i32
    return %c0_i32, %c0_i32_0 : i32, i32
  }
  func.func @transform_3(%arg0: i32, %arg1: i32) -> (i32, i32) {
    %c0_i32 = arith.constant 0 : i32
    return %arg0, %arg1 : i32, i32
  }
}

</mosaic_0001>

<bundles_post_ra>
// kernel: tpu_custom_call.1
= control target key start
LH: loop header
LB: loop body
LE: loop exit
PB: predicated region body
PF: predicated region fallthrough
CT: control target
= control target key end

     0   :  { %8 = vsyncpa [#allocation3], 0  ;;  %s591_s0 = inlined_call_operand.hbm [shape: f32[16,768], index: 0, kind: input, shape index: {}]   ;;  %s592_s1 = inlined_call_operand.hbm [shape: f32[6,128,128], index: 1, kind: input, shape index: {}]   ;;  %s593_s2 = inlined_call_operand.hbm [shape: f32[1,768], index: 2, kind: input, shape index: {}]   ;;  %s594_s3 = inlined_call_operand.hbm [shape: f32[16,768], index: 3, kind: output, shape index: {}]  }
   0x1   :  { %9 = vsyncpa [#allocation6], 0  ;;  %s28_s14 = sshll.u32 %s592_s1, 4  ;;  %s29_s14 = int_to_ptr.hbm [resolvable:$true] %s28_s14 }
   0x2   :  { %10 = vsyncpa [#allocation4], 0  ;;  %s545_s15 = smov [#allocation5]   ;;  %s15_s19 = sshll.u32 %s591_s0, 4  ;;  %s16_s19 = int_to_ptr.hbm [resolvable:$true] %s15_s19 }
   0x3   :  { %s30_s16 = sshll.u32 %s545_s15, 4  ;;  %s546_s20 = smov 128   ;;  %s31_s16 = int_to_ptr.vmem [resolvable:$true] %s30_s16 }
   0x4   :  { %s547_s21 = smov 8   ;;  %s548_s22 = smov [#allocation2]  }
   0x5   :  { %36 = dma.hbm_to_vmem [thread:$0]  %s29_s14, 12288, %s31_s16, [#allocation6], %s546_s20, %s546_s20, %s547_s21  }
   0x6   :  { %s17_s23 = sshll.u32 %s548_s22, 4  ;;  %s549_s24 = smov 768   ;;  %s18_s23 = int_to_ptr.vmem [resolvable:$true] %s17_s23 }
   0x7   :  { %s550_s25 = smov 48   ;;  %s42_s27 = sshll.u32 %s593_s2, 4  ;;  %s43_s27 = int_to_ptr.hbm [resolvable:$true] %s42_s27 }
   0x8   :  { %23 = dma.hbm_to_vmem [thread:$0]  %s16_s19, 1536, %s18_s23, [#allocation3], %s549_s24, %s549_s24, %s550_s25  }
   0x9   :  { %s551_s28 = smov [#allocation7]  }
   0xa   :  { %s44_s0 = sshll.u32 %s551_s28, 4  ;;  %s45_s0 = int_to_ptr.vmem [resolvable:$true] %s44_s0 }
   0xb   :  { %47 = dma.hbm_to_vmem [thread:$0]  %s43_s27, 96, %s45_s0, [#allocation6]  }
   0xc   :  { %539 = dma.done.wait [#allocation3], 1536  }
   0xd   :  { %540 = vsyncadd [#allocation3], 4294965760 }
   0xe   :  { %541 = dma.done.wait [#allocation6], 12384  }
   0xf   :  { %542 = vsyncadd [#allocation6], 4294954912  ;;  %v181_v0 = vld [vmem:[#allocation5 + $0x178] sm:$0xff]  ;;  %v180_v2 = vld [vmem:[#allocation5 + $0x170] sm:$0xff]  ;;  %s552_s2 = smov [#allocation8]   ;;  %s377_s5 = sshll.u32 %s594_s3, 4  ;;  %s378_s5 = int_to_ptr.hbm [resolvable:$true] %s377_s5 }
  0x10   :  { %v233_v1 = vld [vmem:[#allocation5 + $0x1f8] sm:$0xff]  ;;  %190 = vmatpush.msra.mxu2 %v181_v0  ;;  %v232_v3 = vld [vmem:[#allocation5 + $0x1f0] sm:$0xff]  ;;  %v179_v4 = vld [vmem:[#allocation5 + $0x168] sm:$0xff]  ;;  %s375_s29 = sshll.u32 %s552_s2, 4  ;;  %s376_s29 = int_to_ptr.vmem [resolvable:$true] %s375_s29 }
  0x11   :  { %242 = vmatpush.msra.mxu3 %v233_v1  ;;  %v231_v5 = vld [vmem:[#allocation5 + $0x1e8] sm:$0xff]  ;;  %v77_v6 = vld [vmem:[#allocation5 + $0x78] sm:$0xff]  ;;  %v76_v8 = vld [vmem:[#allocation5 + $0x70] sm:$0xff] }
  0x12   :  { %v129_v7 = vld [vmem:[#allocation5 + $0xf8] sm:$0xff]  ;;  %191 = vmatpush.msra.mxu2 %v180_v2  ;;  %v128_v9 = vld [vmem:[#allocation5 + $0xf0] sm:$0xff]  ;;  %86 = vmatpush.msra.mxu0 %v77_v6  ;;  %v178_v10 = vld [vmem:[#allocation5 + $0x160] sm:$0xff] }
  0x13   :  { %243 = vmatpush.msra.mxu3 %v232_v3  ;;  %138 = vmatpush.msra.mxu1 %v129_v7  ;;  %v230_v11 = vld [vmem:[#allocation5 + $0x1e0] sm:$0xff]  ;;  %v75_v12 = vld [vmem:[#allocation5 + $0x68] sm:$0xff]  ;;  %v177_v14 = vld [vmem:[#allocation5 + $0x158] sm:$0xff] }
  0x14   :  { %192 = vmatpush.msra.mxu2 %v179_v4  ;;  %v127_v13 = vld [vmem:[#allocation5 + $0xe8] sm:$0xff]  ;;  %87 = vmatpush.msra.mxu0 %v76_v8  ;;  %v229_v15 = vld [vmem:[#allocation5 + $0x1d8] sm:$0xff]  ;;  %v74_v16 = vld [vmem:[#allocation5 + $0x60] sm:$0xff] }
  0x15   :  { %244 = vmatpush.msra.mxu3 %v231_v5  ;;  %139 = vmatpush.msra.mxu1 %v128_v9  ;;  %v126_v17 = vld [vmem:[#allocation5 + $0xe0] sm:$0xff]  ;;  %v176_v18 = vld [vmem:[#allocation5 + $0x150] sm:$0xff]  ;;  %v73_v20 = vld [vmem:[#allocation5 + $0x58] sm:$0xff] }
  0x16   :  { %193 = vmatpush.msra.mxu2 %v178_v10  ;;  %88 = vmatpush.msra.mxu0 %v75_v12  ;;  %v228_v19 = vld [vmem:[#allocation5 + $0x1d0] sm:$0xff]  ;;  %v125_v21 = vld [vmem:[#allocation5 + $0xd8] sm:$0xff]  ;;  %v175_v22 = vld [vmem:[#allocation5 + $0x148] sm:$0xff] }
  0x17   :  { %245 = vmatpush.msra.mxu3 %v230_v11  ;;  %140 = vmatpush.msra.mxu1 %v127_v13  ;;  %v227_v23 = vld [vmem:[#allocation5 + $0x1c8] sm:$0xff]  ;;  %v72_v24 = vld [vmem:[#allocation5 + $0x50] sm:$0xff]  ;;  %v174_v26 = vld [vmem:[#allocation5 + $0x140] sm:$0xff] }
  0x18   :  { %194 = vmatpush.msra.mxu2 %v177_v14  ;;  %89 = vmatpush.msra.mxu0 %v74_v16  ;;  %v124_v25 = vld [vmem:[#allocation5 + $0xd0] sm:$0xff]  ;;  %v226_v27 = vld [vmem:[#allocation5 + $0x1c0] sm:$0xff]  ;;  %v71_v28 = vld [vmem:[#allocation5 + $0x48] sm:$0xff] }
  0x19   :  { %246 = vmatpush.msra.mxu3 %v229_v15  ;;  %141 = vmatpush.msra.mxu1 %v126_v17  ;;  %v123_v29 = vld [vmem:[#allocation5 + $0xc8] sm:$0xff]  ;;  %v173_v30 = vld [vmem:[#allocation5 + $0x138] sm:$0xff]  ;;  %v70_v32 = vld [vmem:[#allocation5 + $0x40] sm:$0xff] }
  0x1a   :  { %195 = vmatpush.msra.mxu2 %v176_v18  ;;  %90 = vmatpush.msra.mxu0 %v73_v20  ;;  %v225_v31 = vld [vmem:[#allocation5 + $0x1b8] sm:$0xff]  ;;  %v122_v33 = vld [vmem:[#allocation5 + $0xc0] sm:$0xff]  ;;  %v172_v34 = vld [vmem:[#allocation5 + $0x130] sm:$0xff] }
  0x1b   :  { %247 = vmatpush.msra.mxu3 %v228_v19  ;;  %142 = vmatpush.msra.mxu1 %v125_v21  ;;  %v224_v35 = vld [vmem:[#allocation5 + $0x1b0] sm:$0xff]  ;;  %v69_v36 = vld [vmem:[#allocation5 + $0x38] sm:$0xff]  ;;  %v171_v38 = vld [vmem:[#allocation5 + $0x128] sm:$0xff] }
  0x1c   :  { %196 = vmatpush.msra.mxu2 %v175_v22  ;;  %91 = vmatpush.msra.mxu0 %v72_v24  ;;  %v121_v37 = vld [vmem:[#allocation5 + $0xb8] sm:$0xff]  ;;  %v223_v39 = vld [vmem:[#allocation5 + $0x1a8] sm:$0xff]  ;;  %v68_v40 = vld [vmem:[#allocation5 + $0x30] sm:$0xff] }
  0x1d   :  { %248 = vmatpush.msra.mxu3 %v227_v23  ;;  %143 = vmatpush.msra.mxu1 %v124_v25  ;;  %v120_v41 = vld [vmem:[#allocation5 + $0xb0] sm:$0xff]  ;;  %v170_v42 = vld [vmem:[#allocation5 + $0x120] sm:$0xff]  ;;  %v67_v44 = vld [vmem:[#allocation5 + $0x28] sm:$0xff] }
  0x1e   :  { %197 = vmatpush.msra.mxu2 %v174_v26  ;;  %92 = vmatpush.msra.mxu0 %v71_v28  ;;  %v222_v43 = vld [vmem:[#allocation5 + $0x1a0] sm:$0xff]  ;;  %v119_v45 = vld [vmem:[#allocation5 + $0xa8] sm:$0xff]  ;;  %v169_v46 = vld [vmem:[#allocation5 + $0x118] sm:$0xff] }
  0x1f   :  { %249 = vmatpush.msra.mxu3 %v226_v27  ;;  %144 = vmatpush.msra.mxu1 %v123_v29  ;;  %v221_v47 = vld [vmem:[#allocation5 + $0x198] sm:$0xff]  ;;  %v66_v48 = vld [vmem:[#allocation5 + $0x20] sm:$0xff]  ;;  %v168_v50 = vld [vmem:[#allocation5 + $0x110] sm:$0xff] }
  0x20   :  { %198 = vmatpush.msra.mxu2 %v173_v30  ;;  %93 = vmatpush.msra.mxu0 %v70_v32  ;;  %v118_v49 = vld [vmem:[#allocation5 + $0xa0] sm:$0xff]  ;;  %v220_v51 = vld [vmem:[#allocation5 + $0x190] sm:$0xff]  ;;  %v65_v52 = vld [vmem:[#allocation5 + $0x18] sm:$0xff] }
  0x21   :  { %250 = vmatpush.msra.mxu3 %v225_v31  ;;  %145 = vmatpush.msra.mxu1 %v122_v33  ;;  %v117_v53 = vld [vmem:[#allocation5 + $0x98] sm:$0xff]  ;;  %v167_v54 = vld [vmem:[#allocation5 + $0x108] sm:$0xff]  ;;  %v64_v56 = vld [vmem:[#allocation5 + $0x10] sm:$0xff] }
  0x22   :  { %199 = vmatpush.msra.mxu2 %v172_v34  ;;  %94 = vmatpush.msra.mxu0 %v69_v36  ;;  %v219_v55 = vld [vmem:[#allocation5 + $0x188] sm:$0xff]  ;;  %v116_v57 = vld [vmem:[#allocation5 + $0x90] sm:$0xff]  ;;  %v166_v58 = vld [vmem:[#allocation5 + $0x100] sm:$0xff] }
  0x23   :  { %251 = vmatpush.msra.mxu3 %v224_v35  ;;  %146 = vmatpush.msra.mxu1 %v121_v37  ;;  %v218_v59 = vld [vmem:[#allocation5 + $0x180] sm:$0xff]  ;;  %v285_v60 = vld [vmem:[#allocation5 + $0x278] sm:$0xff]  ;;  %v63_v62 = vld [vmem:[#allocation5 + $0x8] sm:$0xff] }
  0x24   :  { %200 = vmatpush.msra.mxu2 %v171_v38  ;;  %95 = vmatpush.msra.mxu0 %v68_v40  ;;  %v337_v61 = vld [vmem:[#allocation5 + $0x2f8] sm:$0xff]  ;;  %v115_v63 = vld [vmem:[#allocation5 + $0x88] sm:$0xff]  ;;  %v284_v0 = vld [vmem:[#allocation5 + $0x270] sm:$0xff] }
  0x25   :  { %252 = vmatpush.msra.mxu3 %v223_v39  ;;  %147 = vmatpush.msra.mxu1 %v120_v41  ;;  %v336_v1 = vld [vmem:[#allocation5 + $0x2f0] sm:$0xff]  ;;  %v62_v2 = vld [vmem:[#allocation5] sm:$0xff]  ;;  %v283_v4 = vld [vmem:[#allocation5 + $0x268] sm:$0xff] }
  0x26   :  { %201 = vmatpush.msra.mxu2 %v170_v42  ;;  %96 = vmatpush.msra.mxu0 %v67_v44  ;;  %v114_v3 = vld [vmem:[#allocation5 + $0x80] sm:$0xff]  ;;  %v335_v5 = vld [vmem:[#allocation5 + $0x2e8] sm:$0xff]  ;;  %v281_v8 = vld [vmem:[#allocation5 + $0x258] sm:$0xff] }
  0x27   :  { %253 = vmatpush.msra.mxu3 %v222_v43  ;;  %148 = vmatpush.msra.mxu1 %v119_v45  ;;  %v282_v6 = vld [vmem:[#allocation5 + $0x260] sm:$0xff]  ;;  %v333_v9 = vld [vmem:[#allocation5 + $0x2d8] sm:$0xff]  ;;  %v280_v10 = vld [vmem:[#allocation5 + $0x250] sm:$0xff] }
  0x28   :  { %202 = vmatpush.msra.mxu2 %v169_v46  ;;  %97 = vmatpush.msra.mxu0 %v66_v48  ;;  %v334_v7 = vld [vmem:[#allocation5 + $0x2e0] sm:$0xff]  ;;  %v332_v11 = vld [vmem:[#allocation5 + $0x2d0] sm:$0xff]  ;;  %v279_v12 = vld [vmem:[#allocation5 + $0x248] sm:$0xff] }
  0x29   :  { %254 = vmatpush.msra.mxu3 %v221_v47  ;;  %149 = vmatpush.msra.mxu1 %v118_v49  ;;  %v331_v13 = vld [vmem:[#allocation5 + $0x2c8] sm:$0xff]  ;;  %v278_v14 = vld [vmem:[#allocation5 + $0x240] sm:$0xff]  ;;  %v163_v16 = vld [vmem:[#allocation2 + $0x10] sm:$0xff] }
  0x2a   :  { %203 = vmatpush.msra.mxu2 %v168_v50  ;;  %98 = vmatpush.msra.mxu0 %v65_v52  ;;  %v330_v15 = vld [vmem:[#allocation5 + $0x2c0] sm:$0xff]  ;;  %v215_v17 = vld [vmem:[#allocation2 + $0x18] sm:$0xff]  ;;  %v276_v20 = vld [vmem:[#allocation5 + $0x230] sm:$0xff] }
  0x2b   :  { %255 = vmatpush.msra.mxu3 %v220_v51  ;;  %150 = vmatpush.msra.mxu1 %v117_v53  ;;  %v277_v18 = vld [vmem:[#allocation5 + $0x238] sm:$0xff]  ;;  %v328_v21 = vld [vmem:[#allocation5 + $0x2b0] sm:$0xff]  ;;  %v275_v22 = vld [vmem:[#allocation5 + $0x228] sm:$0xff] }
  0x2c   :  { %204 = vmatpush.msra.mxu2 %v167_v54  ;;  %99 = vmatpush.msra.mxu0 %v64_v56  ;;  %v329_v19 = vld [vmem:[#allocation5 + $0x2b8] sm:$0xff]  ;;  %v327_v23 = vld [vmem:[#allocation5 + $0x2a8] sm:$0xff]  ;;  %v60_v24 = vld [vmem:[#allocation2] sm:$0xff] }
  0x2d   :  { %256 = vmatpush.msra.mxu3 %v219_v55  ;;  %151 = vmatpush.msra.mxu1 %v116_v57  ;;  %v111_v25 = vld [vmem:[#allocation2 + $0x8] sm:$0xff]  ;;  %v274_v26 = vld [vmem:[#allocation5 + $0x220] sm:$0xff]  ;;  %v273_v30 = vld [vmem:[#allocation5 + $0x218] sm:$0xff] }
  0x2e   :  { %205 = vmatpush.msra.mxu2 %v166_v58  ;;  %100 = vmatpush.msra.mxu0 %v63_v62  ;;  %v326_v27 = vld [vmem:[#allocation5 + $0x2a0] sm:$0xff]  ;;  %v216_v29 = vld [vmem:[#allocation2 + $0x48] sm:$0xff]  ;;  %v325_v31 = vld [vmem:[#allocation5 + $0x298] sm:$0xff] }
  0x2f   :  { %257 = vmatpush.msra.mxu3 %v218_v59  ;;  %152 = vmatpush.msra.mxu1 %v115_v63  ;;  %v164_v28 = vld [vmem:[#allocation2 + $0x40] sm:$0xff]  ;;  %v272_v32 = vld [vmem:[#allocation5 + $0x210] sm:$0xff]  ;;  %v271_v34 = vld [vmem:[#allocation5 + $0x208] sm:$0xff] }
  0x30   :  { %397 = vmatpush.msrb.mxu2 %v285_v60  ;;  %101 = vmatpush.msra.mxu0 %v62_v2  ;;  %v324_v33 = vld [vmem:[#allocation5 + $0x290] sm:$0xff]  ;;  %v323_v35 = vld [vmem:[#allocation5 + $0x288] sm:$0xff]  ;;  %v112_v37 = vld [vmem:[#allocation2 + $0x38] sm:$0xff] }
  0x31   :  { %413 = vmatpush.msrb.mxu3 %v337_v61  ;;  %153 = vmatpush.msra.mxu1 %v114_v3  ;;  %v61_v36 = vld [vmem:[#allocation2 + $0x30] sm:$0xff]  ;;  %v270_v38 = vld [vmem:[#allocation5 + $0x200] sm:$0xff]  ;;  %v320_v41 = vld [vmem:[#allocation2 + $0x58] sm:$0xff] }
  0x32   :  { %398 = vmatpush.msrb.mxu2 %v284_v0  ;;  %294 = vmatpush.msrb.mxu0 %v285_v60  ;;  %v322_v39 = vld [vmem:[#allocation5 + $0x280] sm:$0xff]  ;;  %v268_v40 = vld [vmem:[#allocation2 + $0x50] sm:$0xff]  ;;  %v319_v43 = vld [vmem:[#allocation2 + $0x28] sm:$0xff] }
  0x33   :  { %414 = vmatpush.msrb.mxu3 %v336_v1  ;;  %346 = vmatpush.msrb.mxu1 %v337_v61  ;;  %v267_v42 = vld [vmem:[#allocation2 + $0x20] sm:$0xff] }
  0x34   :  { %399 = vmatpush.msrb.mxu2 %v283_v4  ;;  %295 = vmatpush.msrb.mxu0 %v284_v0  ;;  %v439_v44 = vld [vmem:[#allocation7 + $0x2] ss:$0 sm:$0xff]  ;;  %v437_v45 = vld [vmem:[#allocation7] ss:$0 sm:$0xff]  ;;  %v438_v46 = vld [vmem:[#allocation7 + $0x1] ss:$0 sm:$0xff] }
  0x35   :  { %415 = vmatpush.msrb.mxu3 %v335_v5  ;;  %347 = vmatpush.msrb.mxu1 %v336_v1  ;;  %v440_v47 = vld [vmem:[#allocation7 + $0x3] ss:$0 sm:$0xff]  ;;  %v441_v0 = vld [vmem:[#allocation7 + $0x4] ss:$0 sm:$0xff]  ;;  %v442_v1 = vld [vmem:[#allocation7 + $0x5] ss:$0 sm:$0xff] }
  0x36   :  { %400 = vmatpush.msrb.mxu2 %v282_v6  ;;  %296 = vmatpush.msrb.mxu0 %v283_v4 }
  0x37   :  { %416 = vmatpush.msrb.mxu3 %v334_v7  ;;  %348 = vmatpush.msrb.mxu1 %v335_v5 }
  0x38   :  { %401 = vmatpush.msrb.mxu2 %v281_v8  ;;  %297 = vmatpush.msrb.mxu0 %v282_v6 }
  0x39   :  { %417 = vmatpush.msrb.mxu3 %v333_v9  ;;  %349 = vmatpush.msrb.mxu1 %v334_v7 }
  0x3a   :  { %402 = vmatpush.msrb.mxu2 %v280_v10  ;;  %298 = vmatpush.msrb.mxu0 %v281_v8 }
  0x3b   :  { %418 = vmatpush.msrb.mxu3 %v332_v11  ;;  %350 = vmatpush.msrb.mxu1 %v333_v9 }
  0x3c   :  { %403 = vmatpush.msrb.mxu2 %v279_v12  ;;  %258 = vmatmul.f32.vlgmr.msra.gmra.mxu3 %v215_v17 }
  0x3d   :  { %419 = vmatpush.msrb.mxu3 %v331_v13  ;;  %206 = vmatmul.f32.vlgmr.msra.gmra.mxu2 %v163_v16 }
  0x3e   :  { %404 = vmatpush.msrb.mxu2 %v278_v14  ;;  %299 = vmatpush.msrb.mxu0 %v280_v10 }
  0x3f   :  { %420 = vmatpush.msrb.mxu3 %v330_v15  ;;  %351 = vmatpush.msrb.mxu1 %v332_v11 }
  0x40   :  { %405 = vmatpush.msrb.mxu2 %v277_v18  ;;  %300 = vmatpush.msrb.mxu0 %v279_v12 }
  0x41   :  { %421 = vmatpush.msrb.mxu3 %v329_v19  ;;  %352 = vmatpush.msrb.mxu1 %v331_v13 }
  0x42   :  { %406 = vmatpush.msrb.mxu2 %v276_v20  ;;  %301 = vmatpush.msrb.mxu0 %v278_v14 }
  0x43   :  { %422 = vmatpush.msrb.mxu3 %v328_v21  ;;  %353 = vmatpush.msrb.mxu1 %v330_v15 }
  0x44   :  { %407 = vmatpush.msrb.mxu2 %v275_v22  ;;  %102 = vmatmul.f32.vlgmr.msra.gmra.mxu0 %v60_v24 }
  0x45   :  { %423 = vmatpush.msrb.mxu3 %v327_v23  ;;  %154 = vmatmul.f32.vlgmr.msra.gmra.mxu1 %v111_v25 }
  0x46   :  { %302 = vmatpush.msrb.mxu0 %v277_v18  ;;  %408 = vmatpush.msrb.mxu2 %v274_v26 }
  0x47   :  { %354 = vmatpush.msrb.mxu1 %v329_v19  ;;  %424 = vmatpush.msrb.mxu3 %v326_v27 }
  0x48   :  { %209 = vmatmul.f32.gmra.mxu2 %v164_v28  ;;  %261 = vmatmul.f32.gmra.mxu3 %v216_v29 }
  0x49   :  { %303 = vmatpush.msrb.mxu0 %v276_v20  ;;  %409 = vmatpush.msrb.mxu2 %v273_v30 }
  0x4a   :  { %355 = vmatpush.msrb.mxu1 %v328_v21  ;;  %425 = vmatpush.msrb.mxu3 %v325_v31 }
  0x4b   :  { %304 = vmatpush.msrb.mxu0 %v275_v22  ;;  %410 = vmatpush.msrb.mxu2 %v272_v32 }
  0x4c   :  { %356 = vmatpush.msrb.mxu1 %v327_v23  ;;  %426 = vmatpush.msrb.mxu3 %v324_v33 }
  0x4d   :  { %305 = vmatpush.msrb.mxu0 %v274_v26  ;;  %411 = vmatpush.msrb.mxu2 %v271_v34 }
  0x4e   :  { %357 = vmatpush.msrb.mxu1 %v326_v27  ;;  %427 = vmatpush.msrb.mxu3 %v323_v35 }
  0x4f   :  { %105 = vmatmul.f32.gmra.mxu0 %v61_v36  ;;  %157 = vmatmul.f32.gmra.mxu1 %v112_v37 }
  0x50   :  { %306 = vmatpush.msrb.mxu0 %v273_v30  ;;  %412 = vmatpush.msrb.mxu2 %v270_v38 }
  0x51   :  { %358 = vmatpush.msrb.mxu1 %v325_v31  ;;  %428 = vmatpush.msrb.mxu3 %v322_v39 }
  0x52   :  { %313 = vmatmul.f32.vlgmr.msrb.gmra.mxu2 %v268_v40  ;;  %365 = vmatmul.f32.vlgmr.msrb.gmra.mxu3 %v320_v41 }
  0x53   :  { %307 = vmatpush.msrb.mxu0 %v272_v32  ;;  %359 = vmatpush.msrb.mxu1 %v324_v33 }
  0x55   :  { %308 = vmatpush.msrb.mxu0 %v271_v34  ;;  %360 = vmatpush.msrb.mxu1 %v323_v35 }
  0x57   :  { %309 = vmatpush.msrb.mxu0 %v270_v38  ;;  %361 = vmatpush.msrb.mxu1 %v322_v39 }
  0x58   :  { %310 = vmatmul.f32.vlgmr.msrb.gmra.mxu0 %v267_v42  ;;  %362 = vmatmul.f32.vlgmr.msrb.gmra.mxu1 %v319_v43 }
  0xbf   :  { %v259_v49 = vpop.f32.mrf.mxu3 }
  0xc0   :  { %v207_v48 = vpop.f32.mrf.mxu2  ;;  %v260_v55 = vadd.f32 %v440_v47, %v259_v49 }
  0xc1   :  { %v103_v50 = vpop.f32.mrf.mxu0  ;;  %v208_v52 = vadd.f32 %v439_v44, %v207_v48 }
  0xc2   :  { %v155_v51 = vpop.f32.mrf.mxu1  ;;  %v104_v53 = vadd.f32 %v437_v45, %v103_v50  ;;  %265 = vst [vmem:[#allocation8 + $0x18] sm:$0xff] %v260_v55 }
  0xc3   :  { %v156_v54 = vadd.f32 %v438_v46, %v155_v51  ;;  %213 = vst [vmem:[#allocation8 + $0x10] sm:$0xff] %v208_v52 }
  0xc4   :  { %109 = vst [vmem:[#allocation8] sm:$0xff] %v104_v53 }
  0xc5   :  { %161 = vst [vmem:[#allocation8 + $0x8] sm:$0xff] %v156_v54 }
  0xcb   :  { %v210_v56 = vpop.f32.mrf.mxu2  ;;  %v262_v57 = vpop.f32.mrf.mxu3 }
  0xcc   :  { %v106_v58 = vpop.f32.mrf.mxu0  ;;  %v158_v59 = vpop.f32.mrf.mxu1  ;;  %v211_v60 = vadd.f32 %v439_v44, %v210_v56  ;;  %v263_v63 = vadd.f32 %v440_v47, %v262_v57 }
  0xcd   :  { %v107_v61 = vadd.f32 %v437_v45, %v106_v58  ;;  %v159_v62 = vadd.f32 %v438_v46, %v158_v59 }
  0xce   :  { %214 = vst [vmem:[#allocation8 + $0x40] sm:$0xff] %v211_v60 }
  0xcf   :  { %110 = vst [vmem:[#allocation8 + $0x30] sm:$0xff] %v107_v61 }
  0xd0   :  { %162 = vst [vmem:[#allocation8 + $0x38] sm:$0xff] %v159_v62 }
  0xd1   :  { %266 = vst [vmem:[#allocation8 + $0x48] sm:$0xff] %v263_v63 }
  0xd5   :  { %v311_v2 = vpop.f32.mrf.mxu0  ;;  %v314_v3 = vpop.f32.mrf.mxu2 }
  0xd6   :  { %v312_v4 = vadd.f32 %v441_v0, %v311_v2  ;;  %v315_v5 = vadd.f32 %v441_v0, %v314_v3  ;;  %v363_v6 = vpop.f32.mrf.mxu1  ;;  %v366_v7 = vpop.f32.mrf.mxu3 }
  0xd7   :  { %v364_v8 = vadd.f32 %v442_v1, %v363_v6  ;;  %v367_v9 = vadd.f32 %v442_v1, %v366_v7 }
  0xd8   :  { %317 = vst [vmem:[#allocation8 + $0x20] sm:$0xff] %v312_v4 }
  0xd9   :  { %318 = vst [vmem:[#allocation8 + $0x50] sm:$0xff] %v315_v5 }
  0xda   :  { %369 = vst [vmem:[#allocation8 + $0x28] sm:$0xff] %v364_v8 }
  0xdb   :  { %370 = vst [vmem:[#allocation8 + $0x58] sm:$0xff] %v367_v9 }
  0xdc   :  { %383 = dma.vmem_to_hbm [thread:$0]  %s376_s29, 1536, %s378_s5, [#allocation4], %s549_s24, %s549_s24, %s550_s25  }
  0xdd   :  { %543 = dma.done.wait [#allocation4], 1536  }
  0xde   :  { %544 = vsyncadd [#allocation4], 4294965760 }
  0xdf   :  { %388 = vsyncpa [#allocation3], 1 }
  0xe0   :  { %389 = vsyncpa [#allocation6], 1 }
  0xe1   :  { %390 = vsyncpa [#allocation4], 1 }

</bundles_post_ra>
